<compile_context>
chip_gen: v6e
topology: v6e:2x2x1
jax: 0.10.0
libtpu: 0.0.40
codegen_flags: <defaults>
</compile_context>

<pallas_src>
import functools

import jax
import jax.numpy as jnp
import numpy as np
from jax.experimental import pallas as pl
from jax.experimental.pallas import tpu as pltpu

_LANE = 128  # lane width: pad all feature dims to a multiple of this


def _round_up(n, m):
    return ((n + m - 1) // m) * m


def _pad2d(a, rows, cols):
    return jnp.pad(a, ((0, rows - a.shape[0]), (0, cols - a.shape[1])))


# ---------------------------------------------------------------------------
# Pallas kernel: fully fused MLP (all layers) for one batch tile
# ---------------------------------------------------------------------------
def _mlp_kernel(x_ref, *refs, layer_has_skip, gaussian, alpha, negative_slope):
    """refs = per-layer params (w[, w_skip], b) ... , then the output ref."""
    o_ref = refs[-1]
    prefs = refs[:-1]

    x = x_ref[...]           # (tb, d_in_p) batch tile of (padded) inputs
    inp = x                  # kept resident for skip layers
    n_layers = len(layer_has_skip)

    # Precomputed activation constants (no per-element divides).
    c1 = -1.0 / (2.0 * alpha * alpha)
    c2 = 1.0 / 0.28

    idx = 0
    for l, has_skip in enumerate(layer_has_skip):
        if has_skip:
            w_x = prefs[idx][...]        # (in_p,   out_p)
            w_s = prefs[idx + 1][...]    # (d_in_p, out_p)
            b = prefs[idx + 2][...]      # (1, out_p)
            idx += 3
            y = jnp.dot(x, w_x, preferred_element_type=jnp.float32)
            y = y + jnp.dot(inp, w_s, preferred_element_type=jnp.float32)
        else:
            w = prefs[idx][...]          # (in_p, out_p)
            b = prefs[idx + 1][...]      # (1, out_p)
            idx += 2
            y = jnp.dot(x, w, preferred_element_type=jnp.float32)
        y = y + b                        # bias broadcasts over the batch tile

        if l < n_layers - 1:             # hidden layers get the activation
            if gaussian:
                # GaussianActivation(normalized=True): (exp(-x^2/(2a^2))-0.7)/0.28
                y = (jnp.exp(y * y * c1) - 0.7) * c2
            else:
                # LeakyReLU (slope < 1 => equivalent to max(y, slope*y))
                y = jnp.maximum(y, negative_slope * y)
        x = y

    o_ref[...] = x.astype(o_ref.dtype)


# ---------------------------------------------------------------------------
# Wrapper: pad to lane-dense shapes, build specs, launch one fused kernel
# ---------------------------------------------------------------------------
def mlp_forward_pallas(params, x, *, dims, skip_layer=(), gaussian=False,
                       alpha=1.0, negative_slope=0.01, tb=256):
    num_layers = len(dims)
    d_in, d_out = dims[0], dims[-1]
    B = x.shape[0]

    # Batch tiling: biggest tile up to `tb`, multiple of 8, pad B to a multiple.
    tb = _round_up(min(tb, _round_up(B, 8)), 8)
    B_p = _round_up(B, tb)
    d_in_p = _round_up(d_in, _LANE)
    d_out_p = _round_up(d_out, _LANE)

    x_p = jnp.pad(x, ((0, B_p - B), (0, d_in_p - d_in)))

    operands = [x_p]
    in_specs = [pl.BlockSpec((tb, d_in_p), lambda i: (i, 0))]
    layer_has_skip = []
    flops = 0
    transcendentals = 0
    bytes_accessed = x_p.size * 4

    def const_spec(shape):
        # Resident operand: same block for every grid step (fetched once).
        return pl.BlockSpec(shape, lambda i: (0, 0))

    for l in range(num_layers - 1):
        in_dim, out_dim = dims[l], dims[l + 1]
        in_p = _round_up(in_dim, _LANE)
        out_p = _round_up(out_dim, _LANE)
        w, b = params[l]                    # w: [in_total, out], b: [out]
        has_skip = l in skip_layer
        layer_has_skip.append(has_skip)

        b_p = jnp.pad(b, (0, out_p - out_dim)).reshape(1, out_p)
        if has_skip:
            # Split cat([x, input]) @ W into x @ W_x + input @ W_skip.
            w_x = _pad2d(w[:in_dim], in_p, out_p)
            w_s = _pad2d(w[in_dim:], d_in_p, out_p)
            operands += [w_x, w_s, b_p]
            in_specs += [const_spec((in_p, out_p)),
                         const_spec((d_in_p, out_p)),
                         const_spec((1, out_p))]
            flops += 2 * B_p * (in_p + d_in_p) * out_p
            bytes_accessed += (w_x.size + w_s.size + b_p.size) * 4
        else:
            w_f = _pad2d(w, in_p, out_p)
            operands += [w_f, b_p]
            in_specs += [const_spec((in_p, out_p)), const_spec((1, out_p))]
            flops += 2 * B_p * in_p * out_p
            bytes_accessed += (w_f.size + b_p.size) * 4
        if gaussian and l < num_layers - 2:
            transcendentals += B_p * out_p

    bytes_accessed += B_p * d_out_p * 4

    # TODO(synk): for very large widths (>=2048) the resident (double-buffered)
    # weights would need a Dout grid axis / pl.Buffered(1) to stay under v7x's
    # 64 MiB VMEM; irrelevant at these feature widths.
    kernel = functools.partial(
        _mlp_kernel,
        layer_has_skip=tuple(layer_has_skip),
        gaussian=bool(gaussian),
        alpha=float(alpha),
        negative_slope=float(negative_slope),
    )

    out_padded = pl.pallas_call(
        kernel,
        out_shape=jax.ShapeDtypeStruct((B_p, d_out_p), x.dtype),
        grid=(B_p // tb,),
        in_specs=in_specs,
        out_specs=pl.BlockSpec((tb, d_out_p), lambda i: (i, 0)),
        compiler_params=pltpu.CompilerParams(
            dimension_semantics=("parallel",)),
        cost_estimate=pl.CostEstimate(
            flops=int(flops),
            transcendentals=int(transcendentals),
            bytes_accessed=int(bytes_accessed)),
    )(*operands)

    return out_padded[:B, :d_out]


# ---------------------------------------------------------------------------
# MLP parameter construction (deterministic, mirrors torch module shapes)
# ---------------------------------------------------------------------------
def init_mlp_params(key, d_in, d_out, width, depth, weight_norm=True,
                    skip_layer=()):
    dims = [d_in] + [width] * depth + [d_out]
    num_layers = len(dims)
    params = []
    for l in range(num_layers - 1):
        in_dim = dims[l] + (dims[0] if l in skip_layer else 0)
        out_dim = dims[l + 1]
        key, kw, kb = jax.random.split(key, 3)
        bound = 1.0 / np.sqrt(in_dim)
        # v corresponds to torch Linear.weight with shape [out, in]
        v = jax.random.uniform(kw, (out_dim, in_dim), jnp.float32, -bound, bound)
        bias = jax.random.uniform(kb, (out_dim,), jnp.float32, -bound, bound)
        if weight_norm:
            # torch weight_norm (dim=0): w = g * v/||v||_row, g init = ||v||_row
            norm = jnp.sqrt(jnp.sum(v * v, axis=1, keepdims=True))
            w_eff = norm * v / jnp.maximum(norm, 1e-12)
        else:
            limit = np.sqrt(6.0 / (in_dim + out_dim))
            w_eff = jax.random.uniform(kw, (out_dim, in_dim), jnp.float32,
                                       -limit, limit)
            bias = jnp.zeros((out_dim,), jnp.float32)
        # store transposed [in_total, out] so the kernel computes x @ W + b
        params.append((w_eff.T, bias))
    return params, dims


# pure-JAX reference for a sanity check (mirrors the torch forward exactly)
def mlp_reference(params, x, *, dims, skip_layer=(), gaussian=False,
                  alpha=1.0, negative_slope=0.01):
    num_layers = len(dims)
    inp = x
    for l in range(num_layers - 1):
        w, b = params[l]
        if l in skip_layer:
            x = jnp.concatenate([x, inp], axis=-1)
        x = x @ w + b
        if l < num_layers - 2:
            if gaussian:
                x = (jnp.exp(-(x * x) / (2.0 * alpha * alpha)) - 0.7) / 0.28
            else:
                x = jnp.where(x >= 0, x, negative_slope * x)
    return x


if __name__ == "__main__":
    # small shapes consistent with the module: input [B, D_in]
    B, d_in, d_out, width, depth = 64, 8, 4, 32, 3
    skip_layer = [2]

    key = jax.random.PRNGKey(0)
    key, kx = jax.random.split(key)
    x = jax.random.normal(kx, (B, d_in), jnp.float32)

    params, dims = init_mlp_params(
        key, d_in, d_out, width, depth, weight_norm=True, skip_layer=skip_layer)

    # LeakyReLU path (torch default) and GaussianActivation path
    for gaussian in (False, True):
        out = mlp_forward_pallas(
            params, x, dims=dims, skip_layer=skip_layer, gaussian=gaussian,
            alpha=1.0, tb=256)
        out = jax.block_until_ready(out)
        ref = mlp_reference(
            params, x, dims=dims, skip_layer=skip_layer, gaussian=gaussian,
            alpha=1.0)
        np.testing.assert_allclose(np.asarray(out), np.asarray(ref),
                                   rtol=1e-4, atol=1e-4)

    print("KERNEL_OK")
</pallas_src>

<mosaic_0001>
module attributes {stable_mosaic.version = 11 : i64} {
  func.func @_mlp_kernel(%arg0: i32, %arg1: memref<64x128xf32, #tpu.memory_space<vmem>>, %arg2: memref<128x128xf32, #tpu.memory_space<vmem>>, %arg3: memref<1x128xf32, #tpu.memory_space<vmem>>, %arg4: memref<128x128xf32, #tpu.memory_space<vmem>>, %arg5: memref<1x128xf32, #tpu.memory_space<vmem>>, %arg6: memref<128x128xf32, #tpu.memory_space<vmem>>, %arg7: memref<128x128xf32, #tpu.memory_space<vmem>>, %arg8: memref<1x128xf32, #tpu.memory_space<vmem>>, %arg9: memref<128x128xf32, #tpu.memory_space<vmem>>, %arg10: memref<1x128xf32, #tpu.memory_space<vmem>>, %arg11: memref<64x128xf32, #tpu.memory_space<vmem>>) attributes {dimension_semantics = [#tpu.dimension_semantics<parallel>], iteration_bounds = array<i64: 1>, scalar_prefetch = 0 : i64, scratch_operands = 0 : i64, tpu.core_type = #tpu.core_type<tc>, window_params = [{transform_indices = @transform_0, window_bounds = array<i64: 64, 128>}, {pipeline_mode = #tpu.pipeline_mode<synchronous>, transform_indices = @transform_1, window_bounds = array<i64: 128, 128>}, {pipeline_mode = #tpu.pipeline_mode<synchronous>, transform_indices = @transform_2, window_bounds = array<i64: 1, 128>}, {pipeline_mode = #tpu.pipeline_mode<synchronous>, transform_indices = @transform_3, window_bounds = array<i64: 128, 128>}, {pipeline_mode = #tpu.pipeline_mode<synchronous>, transform_indices = @transform_4, window_bounds = array<i64: 1, 128>}, {pipeline_mode = #tpu.pipeline_mode<synchronous>, transform_indices = @transform_5, window_bounds = array<i64: 128, 128>}, {pipeline_mode = #tpu.pipeline_mode<synchronous>, transform_indices = @transform_6, window_bounds = array<i64: 128, 128>}, {pipeline_mode = #tpu.pipeline_mode<synchronous>, transform_indices = @transform_7, window_bounds = array<i64: 1, 128>}, {pipeline_mode = #tpu.pipeline_mode<synchronous>, transform_indices = @transform_8, window_bounds = array<i64: 128, 128>}, {pipeline_mode = #tpu.pipeline_mode<synchronous>, transform_indices = @transform_9, window_bounds = array<i64: 1, 128>}, {transform_indices = @transform_10, window_bounds = array<i64: 64, 128>}]} {
    %c0 = arith.constant 0 : index
    %c0_0 = arith.constant 0 : index
    %0 = vector.load %arg1[%c0, %c0_0] : memref<64x128xf32, #tpu.memory_space<vmem>>, vector<64x128xf32>
    %c0_1 = arith.constant 0 : index
    %c0_2 = arith.constant 0 : index
    %1 = vector.load %arg2[%c0_1, %c0_2] : memref<128x128xf32, #tpu.memory_space<vmem>>, vector<128x128xf32>
    %c0_3 = arith.constant 0 : index
    %c0_4 = arith.constant 0 : index
    %2 = vector.load %arg3[%c0_3, %c0_4] : memref<1x128xf32, #tpu.memory_space<vmem>>, vector<1x128xf32>
    %cst = arith.constant dense<0.000000e+00> : vector<64x128xf32>
    %3 = tpu.matmul %0, %1, %cst {dimension_numbers = #tpu.dot_dimension_numbers<[1], [0], [0], [1], [0, 0, 1, 1], [], []>} : vector<64x128xf32>, vector<128x128xf32>, vector<64x128xf32> -> vector<64x128xf32>
    %4 = vector.broadcast %2 : vector<1x128xf32> to vector<64x128xf32>
    %5 = arith.addf %3, %4 : vector<64x128xf32>
    %cst_5 = arith.constant 0.00999999977 : f32
    %6 = vector.broadcast %cst_5 : f32 to vector<64x128xf32>
    %7 = arith.mulf %6, %5 : vector<64x128xf32>
    %8 = arith.maximumf %5, %7 : vector<64x128xf32>
    %c0_6 = arith.constant 0 : index
    %c0_7 = arith.constant 0 : index
    %9 = vector.load %arg4[%c0_6, %c0_7] : memref<128x128xf32, #tpu.memory_space<vmem>>, vector<128x128xf32>
    %c0_8 = arith.constant 0 : index
    %c0_9 = arith.constant 0 : index
    %10 = vector.load %arg5[%c0_8, %c0_9] : memref<1x128xf32, #tpu.memory_space<vmem>>, vector<1x128xf32>
    %cst_10 = arith.constant dense<0.000000e+00> : vector<64x128xf32>
    %11 = tpu.matmul %8, %9, %cst_10 {dimension_numbers = #tpu.dot_dimension_numbers<[1], [0], [0], [1], [0, 0, 1, 1], [], []>} : vector<64x128xf32>, vector<128x128xf32>, vector<64x128xf32> -> vector<64x128xf32>
    %12 = vector.broadcast %10 : vector<1x128xf32> to vector<64x128xf32>
    %13 = arith.addf %11, %12 : vector<64x128xf32>
    %cst_11 = arith.constant 0.00999999977 : f32
    %14 = vector.broadcast %cst_11 : f32 to vector<64x128xf32>
    %15 = arith.mulf %14, %13 : vector<64x128xf32>
    %16 = arith.maximumf %13, %15 : vector<64x128xf32>
    %c0_12 = arith.constant 0 : index
    %c0_13 = arith.constant 0 : index
    %17 = vector.load %arg6[%c0_12, %c0_13] : memref<128x128xf32, #tpu.memory_space<vmem>>, vector<128x128xf32>
    %c0_14 = arith.constant 0 : index
    %c0_15 = arith.constant 0 : index
    %18 = vector.load %arg7[%c0_14, %c0_15] : memref<128x128xf32, #tpu.memory_space<vmem>>, vector<128x128xf32>
    %c0_16 = arith.constant 0 : index
    %c0_17 = arith.constant 0 : index
    %19 = vector.load %arg8[%c0_16, %c0_17] : memref<1x128xf32, #tpu.memory_space<vmem>>, vector<1x128xf32>
    %cst_18 = arith.constant dense<0.000000e+00> : vector<64x128xf32>
    %20 = tpu.matmul %16, %17, %cst_18 {dimension_numbers = #tpu.dot_dimension_numbers<[1], [0], [0], [1], [0, 0, 1, 1], [], []>} : vector<64x128xf32>, vector<128x128xf32>, vector<64x128xf32> -> vector<64x128xf32>
    %cst_19 = arith.constant dense<0.000000e+00> : vector<64x128xf32>
    %21 = tpu.matmul %0, %18, %cst_19 {dimension_numbers = #tpu.dot_dimension_numbers<[1], [0], [0], [1], [0, 0, 1, 1], [], []>} : vector<64x128xf32>, vector<128x128xf32>, vector<64x128xf32> -> vector<64x128xf32>
    %22 = arith.addf %20, %21 : vector<64x128xf32>
    %23 = vector.broadcast %19 : vector<1x128xf32> to vector<64x128xf32>
    %24 = arith.addf %22, %23 : vector<64x128xf32>
    %cst_20 = arith.constant 0.00999999977 : f32
    %25 = vector.broadcast %cst_20 : f32 to vector<64x128xf32>
    %26 = arith.mulf %25, %24 : vector<64x128xf32>
    %27 = arith.maximumf %24, %26 : vector<64x128xf32>
    %c0_21 = arith.constant 0 : index
    %c0_22 = arith.constant 0 : index
    %28 = vector.load %arg9[%c0_21, %c0_22] : memref<128x128xf32, #tpu.memory_space<vmem>>, vector<128x128xf32>
    %c0_23 = arith.constant 0 : index
    %c0_24 = arith.constant 0 : index
    %29 = vector.load %arg10[%c0_23, %c0_24] : memref<1x128xf32, #tpu.memory_space<vmem>>, vector<1x128xf32>
    %cst_25 = arith.constant dense<0.000000e+00> : vector<64x128xf32>
    %30 = tpu.matmul %27, %28, %cst_25 {dimension_numbers = #tpu.dot_dimension_numbers<[1], [0], [0], [1], [0, 0, 1, 1], [], []>} : vector<64x128xf32>, vector<128x128xf32>, vector<64x128xf32> -> vector<64x128xf32>
    %31 = vector.broadcast %29 : vector<1x128xf32> to vector<64x128xf32>
    %32 = arith.addf %30, %31 : vector<64x128xf32>
    %c0_26 = arith.constant 0 : index
    %c0_27 = arith.constant 0 : index
    %33 = vector.load %arg11[%c0_26, %c0_27] : memref<64x128xf32, #tpu.memory_space<vmem>>, vector<64x128xf32>
    tpu.vector_store %arg11[%c0_26, %c0_27], %32 {strides = array<i32>} : memref<64x128xf32, #tpu.memory_space<vmem>>, vector<64x128xf32>,
    return
  }
  func.func @transform_0(%arg0: i32) -> (i32, i32) {
    %c0_i32 = arith.constant 0 : i32
    %c0_i32_0 = arith.constant 0 : i32
    return %arg0, %c0_i32 : i32, i32
  }
  func.func @transform_1(%arg0: i32) -> (i32, i32) {
    %c0_i32 = arith.constant 0 : i32
    %c0_i32_0 = arith.constant 0 : i32
    %c0_i32_1 = arith.constant 0 : i32
    return %c0_i32, %c0_i32_0 : i32, i32
  }
  func.func @transform_2(%arg0: i32) -> (i32, i32) {
    %c0_i32 = arith.constant 0 : i32
    %c0_i32_0 = arith.constant 0 : i32
    %c0_i32_1 = arith.constant 0 : i32
    return %c0_i32, %c0_i32_0 : i32, i32
  }
  func.func @transform_3(%arg0: i32) -> (i32, i32) {
    %c0_i32 = arith.constant 0 : i32
    %c0_i32_0 = arith.constant 0 : i32
    %c0_i32_1 = arith.constant 0 : i32
    return %c0_i32, %c0_i32_0 : i32, i32
  }
  func.func @transform_4(%arg0: i32) -> (i32, i32) {
    %c0_i32 = arith.constant 0 : i32
    %c0_i32_0 = arith.constant 0 : i32
    %c0_i32_1 = arith.constant 0 : i32
    return %c0_i32, %c0_i32_0 : i32, i32
  }
  func.func @transform_5(%arg0: i32) -> (i32, i32) {
    %c0_i32 = arith.constant 0 : i32
    %c0_i32_0 = arith.constant 0 : i32
    %c0_i32_1 = arith.constant 0 : i32
    return %c0_i32, %c0_i32_0 : i32, i32
  }
  func.func @transform_6(%arg0: i32) -> (i32, i32) {
    %c0_i32 = arith.constant 0 : i32
    %c0_i32_0 = arith.constant 0 : i32
    %c0_i32_1 = arith.constant 0 : i32
    return %c0_i32, %c0_i32_0 : i32, i32
  }
  func.func @transform_7(%arg0: i32) -> (i32, i32) {
    %c0_i32 = arith.constant 0 : i32
    %c0_i32_0 = arith.constant 0 : i32
    %c0_i32_1 = arith.constant 0 : i32
    return %c0_i32, %c0_i32_0 : i32, i32
  }
  func.func @transform_8(%arg0: i32) -> (i32, i32) {
    %c0_i32 = arith.constant 0 : i32
    %c0_i32_0 = arith.constant 0 : i32
    %c0_i32_1 = arith.constant 0 : i32
    return %c0_i32, %c0_i32_0 : i32, i32
  }
  func.func @transform_9(%arg0: i32) -> (i32, i32) {
    %c0_i32 = arith.constant 0 : i32
    %c0_i32_0 = arith.constant 0 : i32
    %c0_i32_1 = arith.constant 0 : i32
    return %c0_i32, %c0_i32_0 : i32, i32
  }
  func.func @transform_10(%arg0: i32) -> (i32, i32) {
    %c0_i32 = arith.constant 0 : i32
    %c0_i32_0 = arith.constant 0 : i32
    return %arg0, %c0_i32 : i32, i32
  }
}

</mosaic_0001>

<bundles_post_ra>
// kernel: tpu_custom_call.1
= control target key start
LH: loop header
LB: loop body
LE: loop exit
PB: predicated region body
PF: predicated region fallthrough
CT: control target
= control target key end

     0   :  { %15 = vsyncpa [#allocation3], 0  ;;  %s1564_s0 = inlined_call_operand.hbm [shape: f32[64,128], index: 0, kind: input, shape index: {}]   ;;  %s1565_s1 = inlined_call_operand.hbm [shape: f32[128,128], index: 1, kind: input, shape index: {}]   ;;  %s1566_s2 = inlined_call_operand.vmem [shape: f32[1,128], index: 2, kind: input, shape index: {}]   ;;  %s1567_s3 = inlined_call_operand.hbm [shape: f32[128,128], index: 3, kind: input, shape index: {}]   ;;  %s1568_s4 = inlined_call_operand.vmem [shape: f32[1,128], index: 4, kind: input, shape index: {}]   ;;  %s1569_s5 = inlined_call_operand.hbm [shape: f32[128,128], index: 5, kind: input, shape index: {}]   ;;  %s1570_s6 = inlined_call_operand.hbm [shape: f32[128,128], index: 6, kind: input, shape index: {}]   ;;  %s1571_s7 = inlined_call_operand.vmem [shape: f32[1,128], index: 7, kind: input, shape index: {}]   ;;  %s1572_s8 = inlined_call_operand.hbm [shape: f32[128,128], index: 8, kind: input, shape index: {}]   ;;  %s1573_s9 = inlined_call_operand.vmem [shape: f32[1,128], index: 9, kind: input, shape index: {}]   ;;  %s1574_s10 = inlined_call_operand.hbm [shape: f32[64,128], index: 10, kind: output, shape index: {}]  }
   0x1   :  { %16 = vsyncpa [#allocation6], 0 }
   0x2   :  { %17 = vsyncpa [#allocation9], 0 }
   0x3   :  { %18 = vsyncpa [#allocation12], 0 }
   0x4   :  { %19 = vsyncpa [#allocation4], 0  ;;  %s1378_s13 = smov [#allocation5]   ;;  %s1379_s15 = smov [#allocation8]  }
   0x5   :  { %s37_s14 = sshll.u32 %s1378_s13, 4  ;;  %s65_s16 = sshll.u32 %s1379_s15, 4  ;;  %s38_s14 = int_to_ptr.vmem [resolvable:$true] %s37_s14  ;;  %s66_s16 = int_to_ptr.vmem [resolvable:$true] %s65_s16 }
   0x6   :  { %s1236_s17 = scalar_lea.vmem %s38_s14, 2048  ;;  %p1241_p1 = scmp.lt.s32.totalorder %s38_s14, %s38_s14 }
   0x7   :  { %p1237_p0 = scmp.ne.s32.totalorder %s38_s14, %s1236_s17  ;;  %p1242_p2 = scmp.lt.s32.totalorder %s1236_s17, %s1236_s17 }
   0x9   :  { %p1243_p3 = por %p1242_p2, %p1241_p1 }
   0xb   :  { %p1244_p4 = pnand %p1243_p3, %p1237_p0 }
   0xd   :  { %1247 = shalt.err (!%p1244_p4)
}
   0xe   :  { %s1380_s18 = smov 128   ;;  %s1381_s19 = smov 8  }
   0xf   :  { %43 = dma.hbm_to_vmem [thread:$0]  %s1565_s1, 2048, %s38_s14, [#allocation6], %s1380_s18, %s1380_s18, %s1381_s19  }
  0x10   :  { %s1256_s22 = scalar_lea.vmem %s66_s16, 2048  ;;  %p1261_p6 = scmp.lt.s32.totalorder %s66_s16, %s66_s16 }
  0x11   :  { %p1257_p5 = scmp.ne.s32.totalorder %s66_s16, %s1256_s22  ;;  %p1262_p7 = scmp.lt.s32.totalorder %s1256_s22, %s1256_s22 }
  0x13   :  { %p1263_p8 = por %p1262_p7, %p1261_p6 }
  0x15   :  { %p1264_p9 = pnand %p1263_p8, %p1257_p5 }
  0x17   :  { %1267 = shalt.err (!%p1264_p9)
}
  0x18   :  { %71 = dma.hbm_to_vmem [thread:$0]  %s1569_s5, 2048, %s66_s16, [#allocation9], %s1380_s18, %s1380_s18, %s1381_s19  }
  0x19   :  { %s1382_s25 = smov [#allocation2]   ;;  %s1383_s27 = smov [#allocation7]  }
  0x1a   :  { %s25_s26 = sshll.u32 %s1382_s25, 4  ;;  %s51_s28 = sshll.u32 %s1383_s27, 4  ;;  %s26_s26 = int_to_ptr.vmem [resolvable:$true] %s25_s26  ;;  %s52_s28 = int_to_ptr.vmem [resolvable:$true] %s51_s28 }
  0x1b   :  { %s1276_s1 = scalar_lea.vmem %s26_s26, 1024  ;;  %p1281_p11 = scmp.lt.s32.totalorder %s26_s26, %s26_s26 }
  0x1c   :  { %p1277_p10 = scmp.ne.s32.totalorder %s26_s26, %s1276_s1  ;;  %p1282_p12 = scmp.lt.s32.totalorder %s1276_s1, %s1276_s1 }
  0x1e   :  { %p1283_p13 = por %p1282_p12, %p1281_p11 }
  0x20   :  { %p1284_p0 = pnand %p1283_p13, %p1277_p10 }
  0x22   :  { %1287 = shalt.err (!%p1284_p0)
}
  0x23   :  { %31 = dma.hbm_to_vmem [thread:$0]  %s1564_s0, 1024, %s26_s26, [#allocation3], %s1380_s18, %s1380_s18, %s1381_s19  }
  0x24   :  { %s1296_s5 = scalar_lea.vmem %s52_s28, 2048  ;;  %p1301_p2 = scmp.lt.s32.totalorder %s52_s28, %s52_s28 }
  0x25   :  { %p1297_p1 = scmp.ne.s32.totalorder %s52_s28, %s1296_s5  ;;  %p1302_p3 = scmp.lt.s32.totalorder %s1296_s5, %s1296_s5 }
  0x27   :  { %p1303_p4 = por %p1302_p3, %p1301_p2 }
  0x29   :  { %p1304_p5 = pnand %p1303_p4, %p1297_p1 }
  0x2b   :  { %1307 = shalt.err (!%p1304_p5)
}
  0x2c   :  { %57 = dma.hbm_to_vmem [thread:$0]  %s1567_s3, 2048, %s52_s28, [#allocation6], %s1380_s18, %s1380_s18, %s1381_s19  }
  0x2d   :  { %s1384_s13 = smov [#allocation10]   ;;  %s1385_s15 = smov [#allocation11]  }
  0x2e   :  { %s77_s14 = sshll.u32 %s1384_s13, 4  ;;  %s91_s16 = sshll.u32 %s1385_s15, 4  ;;  %s78_s14 = int_to_ptr.vmem [resolvable:$true] %s77_s14  ;;  %s92_s16 = int_to_ptr.vmem [resolvable:$true] %s91_s16 }
  0x2f   :  { %s1316_s0 = scalar_lea.vmem %s78_s14, 2048  ;;  %p1321_p7 = scmp.lt.s32.totalorder %s78_s14, %s78_s14 }
  0x30   :  { %p1317_p6 = scmp.ne.s32.totalorder %s78_s14, %s1316_s0  ;;  %p1322_p8 = scmp.lt.s32.totalorder %s1316_s0, %s1316_s0 }
  0x32   :  { %p1323_p9 = por %p1322_p8, %p1321_p7 }
  0x34   :  { %p1324_p10 = pnand %p1323_p9, %p1317_p6 }
  0x36   :  { %1327 = shalt.err (!%p1324_p10)
}
  0x37   :  { %83 = dma.hbm_to_vmem [thread:$0]  %s1570_s6, 2048, %s78_s14, [#allocation9], %s1380_s18, %s1380_s18, %s1381_s19  }
  0x38   :  { %s1336_s3 = scalar_lea.vmem %s92_s16, 2048  ;;  %p1341_p12 = scmp.lt.s32.totalorder %s92_s16, %s92_s16 }
  0x39   :  { %p1337_p11 = scmp.ne.s32.totalorder %s92_s16, %s1336_s3  ;;  %p1342_p13 = scmp.lt.s32.totalorder %s1336_s3, %s1336_s3 }
  0x3b   :  { %p1343_p0 = por %p1342_p13, %p1341_p12 }
  0x3d   :  { %p1344_p1 = pnand %p1343_p0, %p1337_p11 }
  0x3f   :  { %1347 = shalt.err (!%p1344_p1)
}
  0x40   :  { %97 = dma.hbm_to_vmem [thread:$0]  %s1572_s8, 2048, %s92_s16, [#allocation12], %s1380_s18, %s1380_s18, %s1381_s19  }
  0x41   :  { %1368 = dma.done.wait [#allocation3], 1024  }
  0x42   :  { %1369 = vsyncadd [#allocation3], 4294966272 }
  0x43   :  { %1370 = dma.done.wait [#allocation6], 4096  }
  0x44   :  { %1371 = vsyncadd [#allocation6], 4294963200 }
  0x45   :  { %1372 = dma.done.wait [#allocation9], 4096  }
  0x46   :  { %1373 = vsyncadd [#allocation9], 4294963200 }
  0x47   :  { %1374 = dma.done.wait [#allocation12], 2048  }
  0x48   :  { %1375 = vsyncadd [#allocation12], 4294965248  ;;  %v141_v0 = vld [vmem:[#allocation5 + $0x78] sm:$0xff]  ;;  %v140_v1 = vld [vmem:[#allocation5 + $0x70] sm:$0xff]  ;;  %s1386_s26 = smov [#allocation13]  }
  0x49   :  { %967 = vmatprep.subr.mxu0 %v141_v0  ;;  %v139_v2 = vld [vmem:[#allocation5 + $0x68] sm:$0xff]  ;;  %v138_v3 = vld [vmem:[#allocation5 + $0x60] sm:$0xff]  ;;  %v137_v5 = vld [vmem:[#allocation5 + $0x58] sm:$0xff] }
  0x4a   :  { %968 = vmatpush3.msra.mxu0 %v141_v0  ;;  %v1478_v4 = vld [vmem:[#allocation2] sm:$0xff]  ;;  %v136_v6 = vld [vmem:[#allocation5 + $0x50] sm:$0xff]  ;;  %v285_v7 = vld [vmem:[#allocation7 + $0x78] sm:$0xff] }
  0x4b   :  { %969 = vmatprep.subr.mxu0 %v140_v1  ;;  %999 = vmatprep.mubr.f32.mxu0 %v1478_v4  ;;  %v284_v8 = vld [vmem:[#allocation7 + $0x70] sm:$0xff]  ;;  %v135_v9 = vld [vmem:[#allocation5 + $0x48] sm:$0xff]  ;;  %v134_v11 = vld [vmem:[#allocation5 + $0x40] sm:$0xff] }
  0x4c   :  { %970 = vmatpush3.msra.mxu0 %v140_v1  ;;  %1011 = vmatprep.subr.mxu1 %v285_v7  ;;  %v283_v10 = vld [vmem:[#allocation7 + $0x68] sm:$0xff]  ;;  %v282_v12 = vld [vmem:[#allocation7 + $0x60] sm:$0xff]  ;;  %v133_v13 = vld [vmem:[#allocation5 + $0x38] sm:$0xff] }
  0x4d   :  { %971 = vmatprep.subr.mxu0 %v139_v2  ;;  %1012 = vmatpush3.msra.mxu1 %v285_v7  ;;  %v281_v14 = vld [vmem:[#allocation7 + $0x58] sm:$0xff]  ;;  %v132_v15 = vld [vmem:[#allocation5 + $0x30] sm:$0xff]  ;;  %v131_v17 = vld [vmem:[#allocation5 + $0x28] sm:$0xff] }
  0x4e   :  { %972 = vmatpush3.msra.mxu0 %v139_v2  ;;  %1013 = vmatprep.subr.mxu1 %v284_v8  ;;  %v280_v16 = vld [vmem:[#allocation7 + $0x50] sm:$0xff]  ;;  %v279_v18 = vld [vmem:[#allocation7 + $0x48] sm:$0xff]  ;;  %v130_v19 = vld [vmem:[#allocation5 + $0x20] sm:$0xff] }
  0x4f   :  { %973 = vmatprep.subr.mxu0 %v138_v3  ;;  %1014 = vmatpush3.msra.mxu1 %v284_v8  ;;  %v278_v20 = vld [vmem:[#allocation7 + $0x40] sm:$0xff]  ;;  %v129_v21 = vld [vmem:[#allocation5 + $0x18] sm:$0xff]  ;;  %v128_v23 = vld [vmem:[#allocation5 + $0x10] sm:$0xff] }
  0x50   :  { %974 = vmatpush3.msra.mxu0 %v138_v3  ;;  %1015 = vmatprep.subr.mxu1 %v283_v10  ;;  %v277_v22 = vld [vmem:[#allocation7 + $0x38] sm:$0xff]  ;;  %v276_v24 = vld [vmem:[#allocation7 + $0x30] sm:$0xff]  ;;  %v127_v25 = vld [vmem:[#allocation5 + $0x8] sm:$0xff] }
  0x51   :  { %975 = vmatprep.subr.mxu0 %v137_v5  ;;  %1016 = vmatpush3.msra.mxu1 %v283_v10  ;;  %v275_v26 = vld [vmem:[#allocation7 + $0x28] sm:$0xff]  ;;  %v126_v27 = vld [vmem:[#allocation5] sm:$0xff]  ;;  %v1483_v29 = vld [vmem:[#allocation2 + $0x10] sm:$0xff] }
  0x52   :  { %976 = vmatpush3.msra.mxu0 %v137_v5  ;;  %1017 = vmatprep.subr.mxu1 %v282_v12  ;;  %v1481_v28 = vld [vmem:[#allocation2 + $0x8] sm:$0xff]  ;;  %v1487_v30 = vld [vmem:[#allocation2 + $0x18] sm:$0xff]  ;;  %v1489_v31 = vld [vmem:[#allocation2 + $0x20] sm:$0xff] }
  0x53   :  { %977 = vmatprep.subr.mxu0 %v136_v6  ;;  %1018 = vmatpush3.msra.mxu1 %v282_v12  ;;  %v1493_v32 = vld [vmem:[#allocation2 + $0x28] sm:$0xff]  ;;  %v1495_v33 = vld [vmem:[#allocation2 + $0x30] sm:$0xff]  ;;  %v1499_v34 = vld [vmem:[#allocation2 + $0x38] sm:$0xff] }
  0x54   :  { %978 = vmatpush3.msra.mxu0 %v136_v6  ;;  %1019 = vmatprep.subr.mxu1 %v281_v14  ;;  %v274_v35 = vld [vmem:[#allocation7 + $0x20] sm:$0xff]  ;;  %v273_v36 = vld [vmem:[#allocation7 + $0x18] sm:$0xff]  ;;  %v272_v37 = vld [vmem:[#allocation7 + $0x10] sm:$0xff] }
  0x55   :  { %979 = vmatprep.subr.mxu0 %v135_v9  ;;  %1020 = vmatpush3.msra.mxu1 %v281_v14  ;;  %v271_v38 = vld [vmem:[#allocation7 + $0x8] sm:$0xff]  ;;  %v270_v39 = vld [vmem:[#allocation7] sm:$0xff]  ;;  %v445_v40 = vld [vmem:[#allocation10 + $0x78] sm:$0xff] }
  0x56   :  { %980 = vmatpush3.msra.mxu0 %v135_v9  ;;  %1021 = vmatprep.subr.mxu1 %v280_v16  ;;  %v444_v41 = vld [vmem:[#allocation10 + $0x70] sm:$0xff]  ;;  %v429_v42 = vld [vmem:[#allocation8 + $0x78] sm:$0xff]  ;;  %v443_v43 = vld [vmem:[#allocation10 + $0x68] sm:$0xff] }
  0x57   :  { %981 = vmatprep.subr.mxu0 %v134_v11  ;;  %1022 = vmatpush3.msra.mxu1 %v280_v16  ;;  %v442_v44 = vld [vmem:[#allocation10 + $0x60] sm:$0xff]  ;;  %v441_v45 = vld [vmem:[#allocation10 + $0x58] sm:$0xff]  ;;  %v440_v46 = vld [vmem:[#allocation10 + $0x50] sm:$0xff] }
  0x58   :  { %982 = vmatpush3.msra.mxu0 %v134_v11  ;;  %1023 = vmatprep.subr.mxu1 %v279_v18  ;;  %v439_v47 = vld [vmem:[#allocation10 + $0x48] sm:$0xff]  ;;  %v438_v48 = vld [vmem:[#allocation10 + $0x40] sm:$0xff]  ;;  %v437_v49 = vld [vmem:[#allocation10 + $0x38] sm:$0xff] }
  0x59   :  { %983 = vmatprep.subr.mxu0 %v133_v13  ;;  %1024 = vmatpush3.msra.mxu1 %v279_v18  ;;  %v436_v50 = vld [vmem:[#allocation10 + $0x30] sm:$0xff]  ;;  %v435_v51 = vld [vmem:[#allocation10 + $0x28] sm:$0xff]  ;;  %v434_v52 = vld [vmem:[#allocation10 + $0x20] sm:$0xff] }
  0x5a   :  { %984 = vmatpush3.msra.mxu0 %v133_v13  ;;  %1025 = vmatprep.subr.mxu1 %v278_v20  ;;  %v843_v53 = vld [vmem:[%s1566_s2] ss:$0 sm:$0xff]  ;;  %v428_v6 = vld [vmem:[#allocation8 + $0x70] sm:$0xff]  ;;  %v427_v10 = vld [vmem:[#allocation8 + $0x68] sm:$0xff] }
  0x5b   :  { %985 = vmatprep.subr.mxu0 %v132_v15  ;;  %1026 = vmatpush3.msra.mxu1 %v278_v20  ;;  %v426_v16 = vld [vmem:[#allocation8 + $0x60] sm:$0xff]  ;;  %v425_v20 = vld [vmem:[#allocation8 + $0x58] sm:$0xff] }
  0x5c   :  { %986 = vmatpush3.msra.mxu0 %v132_v15  ;;  %1027 = vmatprep.subr.mxu1 %v277_v22 }
  0x5d   :  { %987 = vmatprep.subr.mxu0 %v131_v17  ;;  %1028 = vmatpush3.msra.mxu1 %v277_v22 }
  0x5e   :  { %988 = vmatpush3.msra.mxu0 %v131_v17  ;;  %1029 = vmatprep.subr.mxu1 %v276_v24 }
  0x5f   :  { %989 = vmatprep.subr.mxu0 %v130_v19  ;;  %1030 = vmatpush3.msra.mxu1 %v276_v24  ;;  %v424_v24 = vld [vmem:[#allocation8 + $0x50] sm:$0xff] }
  0x60   :  { %990 = vmatpush3.msra.mxu0 %v130_v19  ;;  %1031 = vmatprep.subr.mxu1 %v275_v26 }
  0x61   :  { %991 = vmatprep.subr.mxu0 %v129_v21  ;;  %1032 = vmatpush3.msra.mxu1 %v275_v26  ;;  %v423_v26 = vld [vmem:[#allocation8 + $0x48] sm:$0xff] }
  0x62   :  { %992 = vmatpush3.msra.mxu0 %v129_v21  ;;  %1033 = vmatprep.subr.mxu1 %v274_v35 }
  0x63   :  { %993 = vmatprep.subr.mxu0 %v128_v23  ;;  %1034 = vmatpush3.msra.mxu1 %v274_v35  ;;  %v422_v35 = vld [vmem:[#allocation8 + $0x40] sm:$0xff] }
  0x64   :  { %994 = vmatpush3.msra.mxu0 %v128_v23  ;;  %1035 = vmatprep.subr.mxu1 %v273_v36 }
  0x65   :  { %995 = vmatprep.subr.mxu0 %v127_v25  ;;  %1036 = vmatpush3.msra.mxu1 %v273_v36  ;;  %v421_v36 = vld [vmem:[#allocation8 + $0x38] sm:$0xff] }
  0x66   :  { %996 = vmatpush3.msra.mxu0 %v127_v25  ;;  %1037 = vmatprep.subr.mxu1 %v272_v37 }
  0x67   :  { %997 = vmatprep.subr.mxu0 %v126_v27  ;;  %1038 = vmatpush3.msra.mxu1 %v272_v37  ;;  %v420_v37 = vld [vmem:[#allocation8 + $0x30] sm:$0xff] }
  0x68   :  { %998 = vmatpush3.msra.mxu0 %v126_v27  ;;  %1039 = vmatprep.subr.mxu1 %v271_v38 }
  0x69   :  { %1000 = vmatmul.mubr.f32.vlgmr.msra.gmra.mxu0 %v1481_v28  ;;  %1040 = vmatpush3.msra.mxu1 %v271_v38  ;;  %v419_v38 = vld [vmem:[#allocation8 + $0x28] sm:$0xff] }
  0x6a   :  { %1002 = vmatprep.mubr.f32.mxu0 %v1483_v29  ;;  %1041 = vmatprep.subr.mxu1 %v270_v39 }
  0x6b   :  { %1042 = vmatpush3.msra.mxu1 %v270_v39  ;;  %1055 = vmatprep.subr.mxu0 %v445_v40  ;;  %v433_v39 = vld [vmem:[#allocation10 + $0x18] sm:$0xff] }
  0x6c   :  { %1099 = vmatprep.subr.mxu1 %v429_v42  ;;  %1056 = vmatpush3.msra.mxu0 %v445_v40  ;;  %v418_v40 = vld [vmem:[#allocation8 + $0x20] sm:$0xff] }
  0x6d   :  { %1003 = vmatmul.mubr.f32.gmra.mxu0 %v1487_v30  ;;  %1057 = vmatprep.subr.mxu0 %v444_v41 }
  0x6e   :  { %1005 = vmatprep.mubr.f32.mxu0 %v1489_v31  ;;  %1058 = vmatpush3.msra.mxu0 %v444_v41  ;;  %v432_v41 = vld [vmem:[#allocation10 + $0x10] sm:$0xff] }
  0x6f   :  { %1059 = vmatprep.subr.mxu0 %v443_v43 }
  0x70   :  { %1060 = vmatpush3.msra.mxu0 %v443_v43  ;;  %v431_v43 = vld [vmem:[#allocation10 + $0x8] sm:$0xff] }
  0x71   :  { %1006 = vmatmul.mubr.f32.gmra.mxu0 %v1493_v32  ;;  %1061 = vmatprep.subr.mxu0 %v442_v44 }
  0x72   :  { %1008 = vmatprep.mubr.f32.mxu0 %v1495_v33  ;;  %1062 = vmatpush3.msra.mxu0 %v442_v44  ;;  %v416_v44 = vld [vmem:[#allocation8 + $0x10] sm:$0xff] }
  0x73   :  { %1063 = vmatprep.subr.mxu0 %v441_v45 }
  0x74   :  { %1064 = vmatpush3.msra.mxu0 %v441_v45  ;;  %v430_v45 = vld [vmem:[#allocation10] sm:$0xff] }
  0x75   :  { %1009 = vmatmul.mubr.f32.gmra.mxu0 %v1499_v34  ;;  %1065 = vmatprep.subr.mxu0 %v440_v46 }
  0x76   :  { %1087 = vmatprep.mubr.f32.mxu0 %v1478_v4  ;;  %1066 = vmatpush3.msra.mxu0 %v440_v46  ;;  %v415_v46 = vld [vmem:[#allocation8 + $0x8] sm:$0xff] }
  0x77   :  { %1067 = vmatprep.subr.mxu0 %v439_v47 }
  0x78   :  { %1068 = vmatpush3.msra.mxu0 %v439_v47  ;;  %v414_v47 = vld [vmem:[#allocation8] sm:$0xff] }
  0x79   :  { %1069 = vmatprep.subr.mxu0 %v438_v48 }
  0x7a   :  { %1070 = vmatpush3.msra.mxu0 %v438_v48  ;;  %v702_v48 = vld [vmem:[#allocation11 + $0x78] sm:$0xff] }
  0x7b   :  { %1071 = vmatprep.subr.mxu0 %v437_v49 }
  0x7c   :  { %1072 = vmatpush3.msra.mxu0 %v437_v49  ;;  %v701_v49 = vld [vmem:[#allocation11 + $0x70] sm:$0xff] }
  0x7d   :  { %1073 = vmatprep.subr.mxu0 %v436_v50 }
  0x7e   :  { %1074 = vmatpush3.msra.mxu0 %v436_v50  ;;  %v1513_v50 = vld [vmem:[#allocation11 + $0x60] sm:$0xff] }
  0x7f   :  { %1075 = vmatprep.subr.mxu0 %v435_v51 }
  0x80   :  { %1076 = vmatpush3.msra.mxu0 %v435_v51  ;;  %v844_v51 = vld [vmem:[%s1568_s4] ss:$0 sm:$0xff] }
  0x81   :  { %1077 = vmatprep.subr.mxu0 %v434_v52 }
  0x82   :  { %1078 = vmatpush3.msra.mxu0 %v434_v52 }
  0x83   :  { %1079 = vmatprep.subr.mxu0 %v433_v39 }
  0x84   :  { %1080 = vmatpush3.msra.mxu0 %v433_v39 }
  0x85   :  { %1081 = vmatprep.subr.mxu0 %v432_v41 }
  0x86   :  { %1082 = vmatpush3.msra.mxu0 %v432_v41 }
  0x87   :  { %1083 = vmatprep.subr.mxu0 %v431_v43 }
  0x88   :  { %1084 = vmatpush3.msra.mxu0 %v431_v43 }
  0x89   :  { %1085 = vmatprep.subr.mxu0 %v430_v45 }
  0x8a   :  { %1086 = vmatpush3.msra.mxu0 %v430_v45 }
  0x8b   :  { %1088 = vmatmul.mubr.f32.vlgmr.msra.gmra.mxu0 %v1481_v28  ;;  %1143 = vmatprep.subr.mxu0 %v702_v48  ;;  %v700_v28 = vld [vmem:[#allocation11 + $0x68] sm:$0xff] }
  0x8c   :  { %1090 = vmatprep.mubr.f32.mxu0 %v1483_v29  ;;  %1144 = vmatpush3.msra.mxu0 %v702_v48  ;;  %v1515_v29 = vld [vmem:[#allocation11 + $0x58] sm:$0xff] }
  0x8d   :  { %1145 = vmatprep.subr.mxu0 %v701_v49 }
  0x8e   :  { %1146 = vmatpush3.msra.mxu0 %v701_v49 }
  0x8f   :  { %1091 = vmatmul.mubr.f32.gmra.mxu0 %v1487_v30  ;;  %1147 = vmatprep.subr.mxu0 %v700_v28  ;;  %v1519_v30 = vld [vmem:[#allocation11 + $0x50] sm:$0xff] }
  0x90   :  { %1093 = vmatprep.mubr.f32.mxu0 %v1489_v31  ;;  %1148 = vmatpush3.msra.mxu0 %v700_v28  ;;  %v1523_v31 = vld [vmem:[#allocation11 + $0x48] sm:$0xff] }
  0x91   :  { %1149 = vmatprep.subr.mxu0 %v1513_v50 }
  0x92   :  { %1150 = vmatpush3.msra.mxu0 %v1513_v50 }
  0x93   :  { %1094 = vmatmul.mubr.f32.gmra.mxu0 %v1493_v32  ;;  %1151 = vmatprep.subr.mxu0 %v1515_v29  ;;  %v1527_v32 = vld [vmem:[#allocation11 + $0x40] sm:$0xff] }
  0x94   :  { %1096 = vmatprep.mubr.f32.mxu0 %v1495_v33  ;;  %1152 = vmatpush3.msra.mxu0 %v1515_v29  ;;  %v1531_v33 = vld [vmem:[#allocation11 + $0x38] sm:$0xff] }
  0x95   :  { %1153 = vmatprep.subr.mxu0 %v1519_v30 }
  0x96   :  { %1154 = vmatpush3.msra.mxu0 %v1519_v30 }
  0x97   :  { %1097 = vmatmul.mubr.f32.gmra.mxu0 %v1499_v34  ;;  %1155 = vmatprep.subr.mxu0 %v1523_v31  ;;  %v693_v34 = vld [vmem:[#allocation11 + $0x30] sm:$0xff] }
  0x98   :  { %1156 = vmatpush3.msra.mxu0 %v1523_v31 }
  0x99   :  { %1157 = vmatprep.subr.mxu0 %v1527_v32 }
  0x9a   :  { %1158 = vmatpush3.msra.mxu0 %v1527_v32 }
  0x9b   :  { %1159 = vmatprep.subr.mxu0 %v1531_v33 }
  0x9c   :  { %1160 = vmatpush3.msra.mxu0 %v1531_v33 }
  0x9d   :  { %1161 = vmatprep.subr.mxu0 %v693_v34 }
  0x9e   :  { %1162 = vmatpush3.msra.mxu0 %v693_v34 }
 0x129   :  { %v1001_v54 = vpop.f32.mrf.mxu0 }
 0x12a   :  { %v221_v55 = vadd.f32 %v1001_v54, %v843_v53 }
 0x12b   :  { %v215_v56 = vpop.f32.mrf.mxu0 }
 0x12c   :  { %v216_v57 = vadd.f32 %v843_v53, %v215_v56  ;;  %v255_v58 = vmul.f32 0.01, %v221_v55 }
 0x12d   :  { %v1004_v59 = vpop.f32.mrf.mxu0 }
 0x12e   :  { %v231_v60 = vadd.f32 %v1004_v59, %v843_v53  ;;  %v254_v61 = vmul.f32 0.01, %v216_v57  ;;  %v263_v1 = vmax.f32 %v221_v55, %v255_v58 }
 0x12f   :  { %v225_v62 = vpop.f32.mrf.mxu0 }
 0x130   :  { %v226_v63 = vadd.f32 %v843_v53, %v225_v62  ;;  %v262_v0 = vmax.f32 %v216_v57, %v254_v61  ;;  %v257_v2 = vmul.f32 0.01, %v231_v60 }
 0x131   :  { %v1007_v3 = vpop.f32.mrf.mxu0 }
 0x132   :  { %v256_v4 = vmul.f32 0.01, %v226_v63  ;;  %v241_v5 = vadd.f32 %v1007_v3, %v843_v53  ;;  %1043 = vmatprep.mubr.f32.mxu1 %v262_v0  ;;  %v265_v11 = vmax.f32 %v231_v60, %v257_v2 }
 0x133   :  { %v235_v7 = vpop.f32.mrf.mxu0  ;;  %1044 = vmatmul.mubr.f32.vlgmr.msra.gmra.mxu1 %v263_v1 }
 0x134   :  { %v264_v8 = vmax.f32 %v226_v63, %v256_v4  ;;  %v236_v9 = vadd.f32 %v843_v53, %v235_v7  ;;  %1100 = vmatpush3.msra.mxu1 %v429_v42  ;;  %v259_v12 = vmul.f32 0.01, %v241_v5  ;;  %v417_v42 = vld [vmem:[#allocation8 + $0x18] sm:$0xff] }
 0x135   :  { %v1010_v13 = vpop.f32.mrf.mxu0  ;;  %1101 = vmatprep.subr.mxu1 %v428_v6 }
 0x136   :  { %v258_v14 = vmul.f32 0.01, %v236_v9  ;;  %v251_v15 = vadd.f32 %v1010_v13, %v843_v53  ;;  %1046 = vmatprep.mubr.f32.mxu1 %v264_v8  ;;  %1102 = vmatpush3.msra.mxu1 %v428_v6  ;;  %v267_v21 = vmax.f32 %v241_v5, %v259_v12 }
 0x137   :  { %v245_v17 = vpop.f32.mrf.mxu0  ;;  %1047 = vmatmul.mubr.f32.gmra.mxu1 %v265_v11  ;;  %1103 = vmatprep.subr.mxu1 %v427_v10 }
 0x138   :  { %v266_v18 = vmax.f32 %v236_v9, %v258_v14  ;;  %v246_v19 = vadd.f32 %v843_v53, %v245_v17  ;;  %1104 = vmatpush3.msra.mxu1 %v427_v10  ;;  %v261_v22 = vmul.f32 0.01, %v251_v15 }
 0x139   :  { %1105 = vmatprep.subr.mxu1 %v426_v16 }
 0x13a   :  { %v260_v23 = vmul.f32 0.01, %v246_v19  ;;  %1049 = vmatprep.mubr.f32.mxu1 %v266_v18  ;;  %1106 = vmatpush3.msra.mxu1 %v426_v16  ;;  %v269_v27 = vmax.f32 %v251_v15, %v261_v22  ;;  %v690_v22 = vld [vmem:[#allocation11 + $0x18] sm:$0xff] }
 0x13b   :  { %1050 = vmatmul.mubr.f32.gmra.mxu1 %v267_v21  ;;  %1107 = vmatprep.subr.mxu1 %v425_v20  ;;  %v691_v21 = vld [vmem:[#allocation11 + $0x20] sm:$0xff] }
 0x13c   :  { %v268_v25 = vmax.f32 %v246_v19, %v260_v23  ;;  %1108 = vmatpush3.msra.mxu1 %v425_v20  ;;  %v692_v20 = vld [vmem:[#allocation11 + $0x28] sm:$0xff]  ;;  %v689_v23 = vld [vmem:[#allocation11 + $0x10] sm:$0xff] }
 0x13d   :  { %1109 = vmatprep.subr.mxu1 %v424_v24  ;;  %1163 = vmatprep.subr.mxu0 %v692_v20 }
 0x13e   :  { %1052 = vmatprep.mubr.f32.mxu1 %v268_v25  ;;  %1110 = vmatpush3.msra.mxu1 %v424_v24  ;;  %v688_v24 = vld [vmem:[#allocation11 + $0x8] sm:$0xff]  ;;  %v687_v25 = vld [vmem:[#allocation11] sm:$0xff] }
 0x13f   :  { %1053 = vmatmul.mubr.f32.gmra.mxu1 %v269_v27  ;;  %1111 = vmatprep.subr.mxu1 %v423_v26 }
 0x140   :  { %1112 = vmatpush3.msra.mxu1 %v423_v26  ;;  %1164 = vmatpush3.msra.mxu0 %v692_v20 }
 0x141   :  { %1113 = vmatprep.subr.mxu1 %v422_v35  ;;  %1165 = vmatprep.subr.mxu0 %v691_v21 }
 0x142   :  { %1114 = vmatpush3.msra.mxu1 %v422_v35  ;;  %1166 = vmatpush3.msra.mxu0 %v691_v21 }
 0x143   :  { %1115 = vmatprep.subr.mxu1 %v421_v36  ;;  %1167 = vmatprep.subr.mxu0 %v690_v22 }
 0x144   :  { %1116 = vmatpush3.msra.mxu1 %v421_v36  ;;  %1168 = vmatpush3.msra.mxu0 %v690_v22 }
 0x145   :  { %1117 = vmatprep.subr.mxu1 %v420_v37  ;;  %1169 = vmatprep.subr.mxu0 %v689_v23 }
 0x146   :  { %1118 = vmatpush3.msra.mxu1 %v420_v37  ;;  %1170 = vmatpush3.msra.mxu0 %v689_v23  ;;  %v845_v37 = vld [vmem:[%s1571_s7] ss:$0 sm:$0xff] }
 0x147   :  { %1119 = vmatprep.subr.mxu1 %v419_v38  ;;  %1171 = vmatprep.subr.mxu0 %v688_v24 }
 0x148   :  { %1120 = vmatpush3.msra.mxu1 %v419_v38  ;;  %1172 = vmatpush3.msra.mxu0 %v688_v24 }
 0x149   :  { %1121 = vmatprep.subr.mxu1 %v418_v40  ;;  %1173 = vmatprep.subr.mxu0 %v687_v25 }
 0x14a   :  { %1122 = vmatpush3.msra.mxu1 %v418_v40  ;;  %1174 = vmatpush3.msra.mxu0 %v687_v25 }
 0x14b   :  { %1123 = vmatprep.subr.mxu1 %v417_v42  ;;  %v1089_v26 = vpop.f32.mrf.mxu0 }
 0x14c   :  { %1124 = vmatpush3.msra.mxu1 %v417_v42 }
 0x14d   :  { %1125 = vmatprep.subr.mxu1 %v416_v44  ;;  %v513_v27 = vpop.f32.mrf.mxu0 }
 0x14e   :  { %1126 = vmatpush3.msra.mxu1 %v416_v44 }
 0x14f   :  { %1127 = vmatprep.subr.mxu1 %v415_v46  ;;  %v1092_v35 = vpop.f32.mrf.mxu0 }
 0x150   :  { %1128 = vmatpush3.msra.mxu1 %v415_v46 }
 0x151   :  { %1129 = vmatprep.subr.mxu1 %v414_v47  ;;  %v523_v36 = vpop.f32.mrf.mxu0 }
 0x152   :  { %1130 = vmatpush3.msra.mxu1 %v414_v47 }
 0x153   :  { %1187 = vmatprep.subr.mxu1 %v702_v48  ;;  %v1095_v41 = vpop.f32.mrf.mxu0 }
 0x1f3   :  { %v1045_v52 = vpop.f32.mrf.mxu1 }
 0x1f4   :  { %v365_v53 = vadd.f32 %v1045_v52, %v844_v51 }
 0x1f5   :  { %v359_v54 = vpop.f32.mrf.mxu1 }
 0x1f6   :  { %v360_v55 = vadd.f32 %v844_v51, %v359_v54  ;;  %v399_v56 = vmul.f32 0.01, %v365_v53 }
 0x1f7   :  { %v1048_v57 = vpop.f32.mrf.mxu1 }
 0x1f8   :  { %v398_v58 = vmul.f32 0.01, %v360_v55  ;;  %v375_v59 = vadd.f32 %v1048_v57, %v844_v51  ;;  %v407_v63 = vmax.f32 %v365_v53, %v399_v56 }
 0x1f9   :  { %v369_v60 = vpop.f32.mrf.mxu1 }
 0x1fa   :  { %v406_v61 = vmax.f32 %v360_v55, %v398_v58  ;;  %v370_v62 = vadd.f32 %v844_v51, %v369_v60  ;;  %v401_v0 = vmul.f32 0.01, %v375_v59 }
 0x1fb   :  { %v1051_v1 = vpop.f32.mrf.mxu1 }
 0x1fc   :  { %v400_v2 = vmul.f32 0.01, %v370_v62  ;;  %v385_v3 = vadd.f32 %v1051_v1, %v844_v51  ;;  %1131 = vmatprep.mubr.f32.mxu1 %v406_v61  ;;  %v409_v7 = vmax.f32 %v375_v59, %v401_v0 }
 0x1fd   :  { %v379_v4 = vpop.f32.mrf.mxu1  ;;  %1132 = vmatmul.mubr.f32.vlgmr.msra.gmra.mxu1 %v407_v63 }
 0x1fe   :  { %v408_v5 = vmax.f32 %v370_v62, %v400_v2  ;;  %v380_v6 = vadd.f32 %v844_v51, %v379_v4  ;;  %1203 = vmatpush3.msra.mxu1 %v702_v48  ;;  %v403_v8 = vmul.f32 0.01, %v385_v3 }
 0x1ff   :  { %v1054_v9 = vpop.f32.mrf.mxu1  ;;  %1188 = vmatprep.subr.mxu1 %v701_v49 }
 0x200   :  { %v402_v10 = vmul.f32 0.01, %v380_v6  ;;  %v395_v11 = vadd.f32 %v1054_v9, %v844_v51  ;;  %1134 = vmatprep.mubr.f32.mxu1 %v408_v5  ;;  %1204 = vmatpush3.msra.mxu1 %v701_v49  ;;  %v411_v15 = vmax.f32 %v385_v3, %v403_v8  ;;  %v533_v49 = vpop.f32.mrf.mxu0 }
 0x201   :  { %v389_v12 = vpop.f32.mrf.mxu1  ;;  %1135 = vmatmul.mubr.f32.gmra.mxu1 %v409_v7  ;;  %1189 = vmatprep.subr.mxu1 %v700_v28 }
 0x202   :  { %v410_v13 = vmax.f32 %v380_v6, %v402_v10  ;;  %v390_v14 = vadd.f32 %v844_v51, %v389_v12  ;;  %1205 = vmatpush3.msra.mxu1 %v700_v28  ;;  %v405_v16 = vmul.f32 0.01, %v395_v11  ;;  %v1098_v52 = vpop.f32.mrf.mxu0 }
 0x203   :  { %1190 = vmatprep.subr.mxu1 %v1513_v50 }
 0x204   :  { %v404_v17 = vmul.f32 0.01, %v390_v14  ;;  %1137 = vmatprep.mubr.f32.mxu1 %v410_v13  ;;  %1206 = vmatpush3.msra.mxu1 %v1513_v50  ;;  %v413_v19 = vmax.f32 %v395_v11, %v405_v16  ;;  %v543_v62 = vpop.f32.mrf.mxu0  ;;  %v846_v11 = vld [vmem:[%s1573_s9] ss:$0 sm:$0xff]  ;;  %s828_s9 = sshll.u32 %s1386_s26, 4  ;;  %s829_s9 = int_to_ptr.vmem [resolvable:$true] %s828_s9 }
 0x205   :  { %1138 = vmatmul.mubr.f32.gmra.mxu1 %v411_v15  ;;  %1191 = vmatprep.subr.mxu1 %v1515_v29  ;;  %s1348_s27 = scalar_lea.vmem %s829_s9, 1024  ;;  %p1353_p3 = scmp.lt.s32.totalorder %s829_s9, %s829_s9 }
 0x206   :  { %v412_v18 = vmax.f32 %v390_v14, %v404_v17  ;;  %1207 = vmatpush3.msra.mxu1 %v1515_v29  ;;  %p1349_p2 = scmp.ne.s32.totalorder %s829_s9, %s1348_s27  ;;  %p1354_p4 = scmp.lt.s32.totalorder %s1348_s27, %s1348_s27 }
 0x207   :  { %1192 = vmatprep.subr.mxu1 %v1519_v30 }
 0x208   :  { %1140 = vmatprep.mubr.f32.mxu1 %v412_v18  ;;  %1208 = vmatpush3.msra.mxu1 %v1519_v30  ;;  %p1355_p5 = por %p1354_p4, %p1353_p3 }
 0x209   :  { %1141 = vmatmul.mubr.f32.gmra.mxu1 %v413_v19  ;;  %1193 = vmatprep.subr.mxu1 %v1523_v31 }
 0x20a   :  { %1209 = vmatpush3.msra.mxu1 %v1523_v31  ;;  %p1356_p6 = pnand %p1355_p5, %p1349_p2 }
 0x20b   :  { %1194 = vmatprep.subr.mxu1 %v1527_v32 }
 0x20c   :  { %1210 = vmatpush3.msra.mxu1 %v1527_v32 }
 0x20d   :  { %1195 = vmatprep.subr.mxu1 %v1531_v33 }
 0x20e   :  { %1211 = vmatpush3.msra.mxu1 %v1531_v33 }
 0x20f   :  { %1196 = vmatprep.subr.mxu1 %v693_v34 }
 0x210   :  { %1212 = vmatpush3.msra.mxu1 %v693_v34 }
 0x211   :  { %1197 = vmatprep.subr.mxu1 %v692_v20 }
 0x212   :  { %1213 = vmatpush3.msra.mxu1 %v692_v20 }
 0x213   :  { %1198 = vmatprep.subr.mxu1 %v691_v21 }
 0x214   :  { %1214 = vmatpush3.msra.mxu1 %v691_v21 }
 0x215   :  { %1199 = vmatprep.subr.mxu1 %v690_v22 }
 0x216   :  { %1215 = vmatpush3.msra.mxu1 %v690_v22 }
 0x217   :  { %1200 = vmatprep.subr.mxu1 %v689_v23 }
 0x218   :  { %1216 = vmatpush3.msra.mxu1 %v689_v23 }
 0x219   :  { %1201 = vmatprep.subr.mxu1 %v688_v24 }
 0x21a   :  { %1217 = vmatpush3.msra.mxu1 %v688_v24 }
 0x21b   :  { %1202 = vmatprep.subr.mxu1 %v687_v25 }
 0x21c   :  { %1218 = vmatpush3.msra.mxu1 %v687_v25 }
 0x2bd   :  { %v1133_v38 = vpop.f32.mrf.mxu1 }
 0x2be   :  { %v624_v39 = vadd.f32 %v1133_v38, %v1089_v26 }
 0x2bf   :  { %v618_v40 = vpop.f32.mrf.mxu1 }
 0x2c0   :  { %v664_v42 = vadd.f32 %v845_v37, %v624_v39  ;;  %v619_v43 = vadd.f32 %v618_v40, %v513_v27 }
 0x2c1   :  { %v1136_v44 = vpop.f32.mrf.mxu1 }
 0x2c2   :  { %v663_v45 = vadd.f32 %v845_v37, %v619_v43  ;;  %v634_v46 = vadd.f32 %v1136_v44, %v1092_v35  ;;  %v672_v47 = vmul.f32 0.01, %v664_v42 }
 0x2c3   :  { %v628_v48 = vpop.f32.mrf.mxu1 }
 0x2c4   :  { %v671_v28 = vmul.f32 0.01, %v663_v45  ;;  %v666_v50 = vadd.f32 %v845_v37, %v634_v46  ;;  %v629_v29 = vadd.f32 %v628_v48, %v523_v36  ;;  %v680_v34 = vmax.f32 %v664_v42, %v672_v47 }
 0x2c5   :  { %v1139_v30 = vpop.f32.mrf.mxu1 }
 0x2c6   :  { %v665_v31 = vadd.f32 %v845_v37, %v629_v29  ;;  %v644_v32 = vadd.f32 %v1139_v30, %v1095_v41  ;;  %v679_v33 = vmax.f32 %v663_v45, %v671_v28  ;;  %v674_v51 = vmul.f32 0.01, %v666_v50 }
 0x2c7   :  { %v638_v53 = vpop.f32.mrf.mxu1 }
 0x2c8   :  { %v673_v54 = vmul.f32 0.01, %v665_v31  ;;  %v668_v55 = vadd.f32 %v845_v37, %v644_v32  ;;  %v639_v56 = vadd.f32 %v638_v53, %v533_v49  ;;  %1175 = vmatprep.mubr.f32.mxu0 %v679_v33  ;;  %v682_v0 = vmax.f32 %v666_v50, %v674_v51 }
 0x2c9   :  { %v1142_v57 = vpop.f32.mrf.mxu1  ;;  %1176 = vmatmul.mubr.f32.vlgmr.msra.gmra.mxu0 %v680_v34 }
 0x2ca   :  { %v667_v58 = vadd.f32 %v845_v37, %v639_v56  ;;  %v654_v59 = vadd.f32 %v1142_v57, %v1098_v52  ;;  %v681_v60 = vmax.f32 %v665_v31, %v673_v54  ;;  %v676_v61 = vmul.f32 0.01, %v668_v55 }
 0x2cb   :  { %v648_v63 = vpop.f32.mrf.mxu1 }
 0x2cc   :  { %v675_v1 = vmul.f32 0.01, %v667_v58  ;;  %v670_v2 = vadd.f32 %v845_v37, %v654_v59  ;;  %v649_v3 = vadd.f32 %v648_v63, %v543_v62  ;;  %1178 = vmatprep.mubr.f32.mxu0 %v681_v60  ;;  %v684_v6 = vmax.f32 %v668_v55, %v676_v61 }
 0x2cd   :  { %1179 = vmatmul.mubr.f32.gmra.mxu0 %v682_v0 }
 0x2ce   :  { %v669_v4 = vadd.f32 %v845_v37, %v649_v3  ;;  %v683_v5 = vmax.f32 %v667_v58, %v675_v1  ;;  %v678_v7 = vmul.f32 0.01, %v670_v2 }
 0x2d0   :  { %v677_v8 = vmul.f32 0.01, %v669_v4  ;;  %1181 = vmatprep.mubr.f32.mxu1 %v683_v5  ;;  %v686_v10 = vmax.f32 %v670_v2, %v678_v7 }
 0x2d1   :  { %1182 = vmatmul.mubr.f32.vlgmr.msra.gmra.mxu1 %v684_v6 }
 0x2d2   :  { %v685_v9 = vmax.f32 %v669_v4, %v677_v8 }
 0x2d4   :  { %1184 = vmatprep.mubr.f32.mxu1 %v685_v9 }
 0x2d5   :  { %1185 = vmatmul.mubr.f32.gmra.mxu1 %v686_v10 }
 0x389   :  { %v1177_v12 = vpop.f32.mrf.mxu0 }
 0x38a   :  { %v782_v13 = vadd.f32 %v1177_v12, %v846_v11 }
 0x38b   :  { %v776_v14 = vpop.f32.mrf.mxu0 }
 0x38c   :  { %816 = vst [vmem:[#allocation13 + $0x8] sm:$0xff] %v782_v13  ;;  %v777_v15 = vadd.f32 %v846_v11, %v776_v14 }
 0x38d   :  { %v1180_v16 = vpop.f32.mrf.mxu0 }
 0x38e   :  { %815 = vst [vmem:[#allocation13] sm:$0xff] %v777_v15  ;;  %v792_v17 = vadd.f32 %v1180_v16, %v846_v11 }
 0x38f   :  { %v786_v18 = vpop.f32.mrf.mxu0 }
 0x390   :  { %818 = vst [vmem:[#allocation13 + $0x18] sm:$0xff] %v792_v17  ;;  %v787_v19 = vadd.f32 %v846_v11, %v786_v18 }
 0x391   :  { %v1183_v20 = vpop.f32.mrf.mxu1 }
 0x392   :  { %817 = vst [vmem:[#allocation13 + $0x10] sm:$0xff] %v787_v19  ;;  %v802_v21 = vadd.f32 %v1183_v20, %v846_v11 }
 0x393   :  { %v796_v22 = vpop.f32.mrf.mxu1 }
 0x394   :  { %820 = vst [vmem:[#allocation13 + $0x28] sm:$0xff] %v802_v21  ;;  %v797_v23 = vadd.f32 %v846_v11, %v796_v22 }
 0x395   :  { %v1186_v24 = vpop.f32.mrf.mxu1 }
 0x396   :  { %819 = vst [vmem:[#allocation13 + $0x20] sm:$0xff] %v797_v23  ;;  %v812_v25 = vadd.f32 %v1186_v24, %v846_v11 }
 0x397   :  { %v806_v26 = vpop.f32.mrf.mxu1 }
 0x398   :  { %822 = vst [vmem:[#allocation13 + $0x38] sm:$0xff] %v812_v25  ;;  %v807_v27 = vadd.f32 %v846_v11, %v806_v26 }
 0x39a   :  { %821 = vst [vmem:[#allocation13 + $0x30] sm:$0xff] %v807_v27 }
 0x39b   :  { %1359 = shalt.err (!%p1356_p6)
}
 0x39c   :  { %834 = dma.vmem_to_hbm [thread:$0]  %s829_s9, 1024, %s1574_s10, [#allocation4], %s1380_s18, %s1380_s18, %s1381_s19  }
 0x39d   :  { %1376 = dma.done.wait [#allocation4], 1024  }
 0x39e   :  { %1377 = vsyncadd [#allocation4], 4294966272 }
 0x39f   :  { %838 = vsyncpa [#allocation3], 1 }
 0x3a0   :  { %839 = vsyncpa [#allocation6], 1 }
 0x3a1   :  { %840 = vsyncpa [#allocation9], 1 }
 0x3a2   :  { %841 = vsyncpa [#allocation12], 1 }
 0x3a3   :  { %842 = vsyncpa [#allocation4], 1 }

</bundles_post_ra>
